<compile_context>
chip_gen: v5e
topology: v5e:2x2
jax: 0.10.0
libtpu: 0.0.40
codegen_flags: <defaults>
</compile_context>

<pallas_src>
import functools

import jax
import jax.numpy as jnp
from jax.experimental import pallas as pl
from jax.experimental.pallas import tpu as pltpu


_LANE_CANDIDATES = (8192, 4096, 2048, 1024, 512, 256, 128)
_MIN_GRID_STEPS = 8              # pipeline depth target (>= 4 per TC on v7x)
_SMALL_CUTOFF_BYTES = 512 << 10  # below this, XLA-fused add beats pallas_call


def _add_one_kernel(x_ref, o_ref):
    # Elementwise hot path: out = x + 1 (computed in the output dtype).
    o_ref[...] = x_ref[...] + jnp.asarray(1, dtype=o_ref.dtype)


def _sublane_pack(itemsize):
    """Rows per sublane-packed tile: 8 for f32, 16 for bf16/f16, 32 for int8."""
    return max(8, 32 // int(itemsize))


@functools.lru_cache(maxsize=1)
def _tpu_block_config():
    """Per-generation (target_block_bytes, vmem_limit_bytes-or-None)."""
    try:
        kind = jax.devices()[0].device_kind.lower()
    except Exception:  # pragma: no cover - defensive
        kind = ""
    if "v7" in kind:
        # 4 MiB blocks x 4 double buffers = 16 MiB of the 32 MiB scoped
        # default (64 MiB physical) -> amortizes per-step cost at 3.2 TB/s.
        return 4 << 20, 32 << 20
    if "v6" in kind:
        # Measured v6e f32-add: 1 MiB tile -> 85% roofline, 4 MiB -> 86%.
        return 4 << 20, 32 << 20
    # v5e (16 MiB default scoped VMEM, ~820 GB/s) and unknown chips: stay
    # conservative so 2 in + 2 out buffers leave headroom for scratch.
    return 2 << 20, None


def _pick_lane(n_elems, itemsize):
    """Widest lane (multiple of 128) dividing the array that still leaves
    enough rows for >= _MIN_GRID_STEPS grid steps; else widest divisor."""
    sub = _sublane_pack(itemsize)
    widest = None
    for lane in _LANE_CANDIDATES:
        if n_elems % lane == 0:
            if widest is None:
                widest = lane
            if (n_elems // lane) >= _MIN_GRID_STEPS * sub:
                return lane
    return widest


def _pick_tile_rows(rows, lane, itemsize, target_block_bytes):
    """Row tile: hits the per-generation block-byte target, rounded to the
    dtype's sublane packing, capped so the grid keeps >= _MIN_GRID_STEPS
    steps for DMA/compute overlap."""
    sub = _sublane_pack(itemsize)
    if rows <= sub:
        return rows  # full extent -> exempt from the divisibility rule
    target = max(sub, (target_block_bytes // (lane * itemsize)) // sub * sub)
    depth_cap = (rows // _MIN_GRID_STEPS) // sub * sub
    if depth_cap >= sub:
        target = min(target, depth_cap)
    return max(sub, min(target, rows // sub * sub))


def add_one_pallas(slab, *, donate=False):
    """slab: [rows, lane] with lane a multiple of 128 (lane-dense layout)."""
    rows, lane = slab.shape
    itemsize = jnp.dtype(slab.dtype).itemsize
    target_block_bytes, vmem_limit = _tpu_block_config()
    tile_r = _pick_tile_rows(rows, lane, itemsize, target_block_bytes)
    grid = (pl.cdiv(rows, tile_r),)

    cp_kwargs = dict(dimension_semantics=("parallel",))  # shard rows over TCs
    if vmem_limit is not None:
        cp_kwargs["vmem_limit_bytes"] = vmem_limit

    call_kwargs = {}
    if donate:
        # Only beneficial if the caller actually donates the input buffer;
        # otherwise XLA inserts a defensive copy (extra HBM traffic).
        call_kwargs["input_output_aliases"] = {0: 0}

    return pl.pallas_call(
        _add_one_kernel,
        out_shape=jax.ShapeDtypeStruct((rows, lane), slab.dtype),
        grid_spec=pltpu.PrefetchScalarGridSpec(
            num_scalar_prefetch=0,
            grid=grid,
            in_specs=[pl.BlockSpec((tile_r, lane), lambda i: (i, 0))],
            out_specs=pl.BlockSpec((tile_r, lane), lambda i: (i, 0)),
        ),
        compiler_params=pltpu.CompilerParams(**cp_kwargs),
        **call_kwargs,
    )(slab)


def add_one(x, *, donate=False):
    """out = x + 1 for any shape/dtype; Pallas path when size/layout allow."""
    n_elems = x.size
    itemsize = jnp.dtype(x.dtype).itemsize
    n_bytes = n_elems * itemsize

    if n_elems == 0 or n_bytes < _SMALL_CUTOFF_BYTES:
        # Tiny inputs: pallas_call dispatch overhead dominates; a fused XLA
        # add is strictly faster.
        return x + jnp.asarray(1, x.dtype)

    lane = _pick_lane(n_elems, itemsize)
    if lane is None:
        # Awkward sizes (not divisible by 128): XLA-fused add beats
        # pad + Pallas + slice (which would add 2-3x redundant HBM traffic).
        return x + jnp.asarray(1, x.dtype)

    slab = jnp.reshape(x, (n_elems // lane, lane))  # row-major reshape: free
    out_slab = add_one_pallas(slab, donate=donate)
    return jnp.reshape(out_slab, x.shape)


class ModelPallas:
    """JAX/Pallas equivalent of the PyTorch Model."""

    def __init__(self, key):
        # conv1/conv2 exist in the PyTorch module's __init__ but are never
        # used in forward.  Initialize them deterministically for parity.
        k1, k2, k3, k4 = jax.random.split(key, 4)
        self.conv1_w = jax.random.normal(k1, (20, 1, 5, 5), jnp.float32) * 0.1
        self.conv1_b = jax.random.normal(k2, (20,), jnp.float32) * 0.1
        self.conv2_w = jax.random.normal(k3, (20, 20, 5, 5), jnp.float32) * 0.1
        self.conv2_b = jax.random.normal(k4, (20,), jnp.float32) * 0.1

    def __call__(self, x):
        return add_one(x)


if __name__ == "__main__":
    key = jax.random.PRNGKey(0)
    model = ModelPallas(key)

    # 1) Primary small test (2,4,16,16 = 8 KiB): takes the small-size XLA
    #    fallback path (per review, faster than paying pallas_call overhead).
    x = jax.random.normal(jax.random.PRNGKey(0), (2, 4, 16, 16), jnp.float32)
    y = jax.block_until_ready(model(x))
    assert y.shape == x.shape and y.dtype == x.dtype
    assert jnp.allclose(y, x + 1.0, atol=1e-6), "mismatch vs reference (small)"

    # 2) Pallas pipelined path: 1M f32 elems (4 MiB) -> lane=8192, rows=128,
    #    tile_r=16, grid=8 (full pipeline depth).
    x2 = jax.random.normal(jax.random.PRNGKey(1), (16, 4, 128, 128), jnp.float32)
    y2 = jax.block_until_ready(model(x2))
    assert jnp.allclose(y2, x2 + 1.0, atol=1e-6), "mismatch vs reference (tiled)"

    # 3) Pallas path with a partial last row tile (rows % tile_r != 0),
    #    exercising blocked-OOB masked writeback on the final step.
    x3 = jax.random.normal(jax.random.PRNGKey(2), (5, 9, 8192), jnp.float32)
    y3 = jax.block_until_ready(model(x3))
    assert jnp.allclose(y3, x3 + 1.0, atol=1e-6), "mismatch vs reference (partial tile)"

    # 4) bf16 path (dtype-aware sublane rounding: tile_r multiple of 16).
    x4 = jax.random.normal(
        jax.random.PRNGKey(3), (16, 8, 128, 128), jnp.float32
    ).astype(jnp.bfloat16)
    y4 = jax.block_until_ready(model(x4))
    ref4 = x4 + jnp.asarray(1, x4.dtype)
    assert jnp.allclose(y4.astype(jnp.float32), ref4.astype(jnp.float32)), \
        "mismatch vs reference (bf16)"

    # 5) Fallback path (size not divisible by 128) stays correct too.
    x5 = jax.random.normal(jax.random.PRNGKey(4), (3, 5, 7), jnp.float32)
    y5 = jax.block_until_ready(model(x5))
    assert jnp.allclose(y5, x5 + 1.0, atol=1e-6), "mismatch vs reference (fallback)"

    print("KERNEL_OK")
</pallas_src>

<mosaic_0001>
module attributes {stable_mosaic.version = 11 : i64} {
  func.func @_add_one_kernel(%arg0: i32, %arg1: memref<16x8192xf32, #tpu.memory_space<vmem>>, %arg2: memref<16x8192xf32, #tpu.memory_space<vmem>>) attributes {dimension_semantics = [#tpu.dimension_semantics<parallel>], iteration_bounds = array<i64: 8>, scalar_prefetch = 0 : i64, scratch_operands = 0 : i64, tpu.core_type = #tpu.core_type<tc>, window_params = [{transform_indices = @transform_0, window_bounds = array<i64: 16, 8192>}, {transform_indices = @transform_1, window_bounds = array<i64: 16, 8192>}]} {
    %c0 = arith.constant 0 : index
    %c0_0 = arith.constant 0 : index
    %0 = vector.load %arg1[%c0, %c0_0] : memref<16x8192xf32, #tpu.memory_space<vmem>>, vector<16x8192xf32>
    %cst = arith.constant 1.000000e+00 : f32
    %1 = vector.broadcast %cst : f32 to vector<16x8192xf32>
    %2 = arith.addf %0, %1 : vector<16x8192xf32>
    %c0_1 = arith.constant 0 : index
    %c0_2 = arith.constant 0 : index
    %3 = vector.load %arg2[%c0_1, %c0_2] : memref<16x8192xf32, #tpu.memory_space<vmem>>, vector<16x8192xf32>
    tpu.vector_store %arg2[%c0_1, %c0_2], %2 {strides = array<i32>} : memref<16x8192xf32, #tpu.memory_space<vmem>>, vector<16x8192xf32>,
    return
  }
  func.func @transform_0(%arg0: i32) -> (i32, i32) {
    %c0_i32 = arith.constant 0 : i32
    %c0_i32_0 = arith.constant 0 : i32
    return %arg0, %c0_i32 : i32, i32
  }
  func.func @transform_1(%arg0: i32) -> (i32, i32) {
    %c0_i32 = arith.constant 0 : i32
    %c0_i32_0 = arith.constant 0 : i32
    return %arg0, %c0_i32 : i32, i32
  }
}

</mosaic_0001>

<bundles_post_ra>
// kernel: tpu_custom_call.1
= control target key start
LH: loop header
LB: loop body
LE: loop exit
PB: predicated region body
PF: predicated region fallthrough
CT: control target
= control target key end

     0   :  { %6 = vsyncpa [#allocation3], 0  ;;  %s1182_s0 = inlined_call_operand.hbm [shape: f32[128,8192], index: 0, kind: input, shape index: {}]   ;;  %s1183_s1 = inlined_call_operand.hbm [shape: f32[128,8192], index: 1, kind: output, shape index: {}]  }
   0x1   :  { %8 = vsyncpa [#allocation3 + $0x1], 0 }
   0x2   :  { %9 = vsyncpa [#allocation4], 0 }
   0x3   :  { %11 = vsyncpa [#allocation4 + $0x1], 0  ;;  %s796_s6 = smov 0   ;;  %s798_s7 = smov 0  }
   0x4   :  { %s800_s8 = smov 0   ;;  %s802_s9 = smov 0  }
   0x5 LB: > { %s817_s10 = sadd.s32 4294967295, %s780_s9   ;;  %s614_s11 = sadd.s32 4294967294, %s780_s9   ;;  %s780_s9 = sphi %s802_s9, %s1192_s9   ;;  %s776_s8 = sphi %s800_s8, %s1191_s8   ;;  %s772_s7 = sphi %s798_s7, %s1190_s7   ;;  %s768_s6 = sphi %s796_s6, %s1189_s6  }
   0x6   : > { %s821_s12 = sadd.s32 1, %s780_s9   ;;  %s24_s13 = sadd.s32 1, %s776_s8 }
   0x7   : > { %s21_s14 = ssub.s32 %s780_s9, %s821_s12  ;;  %p31_p0 = scmp.ne.s32.totalorder %s776_s8, %s772_s7 }
   0x8   : > { %p22_p1 = scmp.eq.s32.totalorder %s21_s14, 0  ;;  %p32_p2 = scmp.eq.s32.totalorder %s780_s9, 0 }
   0x9   : > { %p37_p3 = scmp.ne.s32.totalorder %s772_s7, %s768_s6  ;;  %p38_p4 = scmp.eq.s32.totalorder %s817_s10, 0 }
   0xa   : > { %s833_s15 = scalar_select %p22_p1, %s776_s8, %s24_s13  }
   0xb   : > { %p835_p5 = por %p32_p2, %p31_p0  ;;  %p839_p6 = por %p38_p4, %p37_p3 }
   0xc   : > { %p61_p7 = scmp.eq.s32.totalorder %s817_s10, 7  ;;  %p67_p8 = scmp.eq.s32.totalorder %s614_s11, 7 }
   0xd   : > { %p646_p9 = scmp.lt.s32.totalorder %s780_s9, 8  ;;  %s87_s20 = sand.u32 1, %s776_s8  }
   0xe   : > { %p845_p10 = por %p61_p7, %p31_p0  ;;  %p849_p11 = por %p67_p8, %p37_p3 }
   0xf   : > { %s631_s21 = sshll.u32 %s780_s9, 10  ;;  %s617_s22 = sshll.u32 %s87_s20, 10 }
  0x10   : > { %s97_s25 = scalar_lea.hbm %s1182_s0, %s631_s21  ;;  %s91_s27 = scalar_lea.vmem [#allocation2], %s617_s22 }
  0x11   : > { %s98_s26 = sshll.u32 %s97_s25, 4  ;;  %s100_s28 = sshll.u32 %s91_s27, 4  ;;  %s99_s26 = int_to_ptr.hbm [resolvable:$true] %s98_s26  ;;  %s101_s28 = int_to_ptr.vmem [resolvable:$true] %s100_s28 }
  0x12   : > { %p860_p12 = pnand %p646_p9, %p835_p5  ;;  %p621_p13 = scmp.ge.s32.totalorder %s780_s9, 1 }
  0x13   : > { %p108_p0 = scmp.lt.s32.totalorder %s780_s9, 9  ;;  %s88_s30 = scalar_lea.sflag [#allocation3], %s87_s20 }
  0x14   : > { %s684_s2 = sshra.s32 %s99_s26, 4  ;;  %p688_p2 = pneg %p860_p12  ;;  %s685_s2 = int_to_ptr.hbm [resolvable:$true] %s684_s2 }
  0x15   : > { %s686_s3 = scalar_lea.hbm %s685_s2, 1024  ;;  %s691_s11 = scalar_lea.hbm %s1182_s0, 8192 }
  0x16   : > { %p687_p1 = scmp.ne.s32.totalorder %s685_s2, %s686_s3  ;;  %p692_p5 = scmp.lt.s32.totalorder %s685_s2, %s1182_s0 }
  0x17   : > { %p693_p7 = scmp.lt.s32.totalorder %s691_s11, %s686_s3 }
  0x18   : > { %p689_p3 = pnand %p688_p2, %p687_p1 }
  0x19   : > { %p694_p8 = por %p693_p7, %p692_p5 }
  0x1a   : > { %p690_p4 = pneg %p689_p3 }
  0x1c   : > { %p695_p9 = pnand %p694_p8, %p690_p4 }
  0x1e   : > { %698 = shalt.err (!%p695_p9)
}
  0x1f   : > { %s782_s16 = smov 8192   ;;  %s783_s20 = smov 512  }
  0x20   : > { %641 = dma.hbm_to_vmem [thread:$0]  (!%p860_p12), %s99_s26, 16384, %s101_s28, %s88_s30, %s782_s16, %s782_s16, %s783_s20  }
  0x21   : > { %p109_p1 = pnand %p621_p13, %p108_p0 }
  0x22   : > { %s881_s21 = sand.u32 (!%p109_p1), 1, %s772_s7  }
  0x23   : > { %112 = sbr.rel (%p109_p1) target bundleno = 175 (0xaf), region = 24  ;;  %s622_s22 = sshll.u32 (!%p109_p1), %s881_s21, 10 }
  0x24   : > { %s115_s23 = scalar_lea.sflag (!%p109_p1), [#allocation3], %s881_s21  ;;  %s885_s24 = scalar_lea.vmem (!%p109_p1), [#allocation2], %s622_s22 }
  0x28   : > { %759 = dma.done.wait (%p839_p6), %s115_s23, 16384  }
  0x29   : > { %761 = vsyncadd (%p839_p6), %s115_s23, 4294950912  ;;  %v140_v0 = vld [vmem:[%s885_s24] sm:$0xff]  ;;  %v141_v1 = vld [vmem:[%s885_s24 + $0x8] sm:$0xff]  ;;  %s898_s17 = scalar_lea.vmem [#allocation5], %s622_s22  ;;  %s633_s25 = sshll.u32 %s817_s10, 10 }
  0x2a   : > { %v142_v2 = vld [vmem:[%s885_s24 + $0x10] sm:$0xff]  ;;  %v268_v3 = vadd.f32 1.0, %v140_v0  ;;  %v269_v4 = vadd.f32 1.0, %v141_v1  ;;  %v143_v6 = vld [vmem:[%s885_s24 + $0x18] sm:$0xff]  ;;  %v144_v7 = vld [vmem:[%s885_s24 + $0x20] sm:$0xff]  ;;  %s537_s28 = scalar_lea.hbm %s1183_s1, %s633_s25  ;;  %s538_s10 = sshll.u32 %s898_s17, 4  ;;  %s539_s10 = int_to_ptr.vmem [resolvable:$true] %s538_s10 }
  0x2b   : > { %v270_v5 = vadd.f32 1.0, %v142_v2  ;;  %v145_v8 = vld [vmem:[%s885_s24 + $0x28] sm:$0xff]  ;;  %v271_v9 = vadd.f32 1.0, %v143_v6  ;;  %v146_v10 = vld [vmem:[%s885_s24 + $0x30] sm:$0xff]  ;;  %v272_v11 = vadd.f32 1.0, %v144_v7  ;;  %v147_v12 = vld [vmem:[%s885_s24 + $0x38] sm:$0xff] }
  0x2c   : > { %396 = vst [vmem:[%s898_s17] sm:$0xff] %v268_v3  ;;  %v273_v13 = vadd.f32 1.0, %v145_v8  ;;  %v148_v14 = vld [vmem:[%s885_s24 + $0x40] sm:$0xff]  ;;  %v274_v15 = vadd.f32 1.0, %v146_v10  ;;  %v149_v16 = vld [vmem:[%s885_s24 + $0x48] sm:$0xff]  ;;  %v275_v17 = vadd.f32 1.0, %v147_v12  ;;  %v150_v18 = vld [vmem:[%s885_s24 + $0x50] sm:$0xff] }
  0x2d   : > { %397 = vst [vmem:[%s898_s17 + $0x8] sm:$0xff] %v269_v4  ;;  %v276_v19 = vadd.f32 1.0, %v148_v14  ;;  %v151_v20 = vld [vmem:[%s885_s24 + $0x58] sm:$0xff]  ;;  %v277_v21 = vadd.f32 1.0, %v149_v16  ;;  %v152_v22 = vld [vmem:[%s885_s24 + $0x60] sm:$0xff]  ;;  %v278_v23 = vadd.f32 1.0, %v150_v18 }
  0x2e   : > { %398 = vst [vmem:[%s898_s17 + $0x10] sm:$0xff] %v270_v5  ;;  %v153_v24 = vld [vmem:[%s885_s24 + $0x68] sm:$0xff]  ;;  %v279_v25 = vadd.f32 1.0, %v151_v20  ;;  %v154_v26 = vld [vmem:[%s885_s24 + $0x70] sm:$0xff]  ;;  %v280_v27 = vadd.f32 1.0, %v152_v22  ;;  %v155_v28 = vld [vmem:[%s885_s24 + $0x78] sm:$0xff] }
  0x2f   : > { %399 = vst [vmem:[%s898_s17 + $0x18] sm:$0xff] %v271_v9  ;;  %v281_v29 = vadd.f32 1.0, %v153_v24  ;;  %v156_v30 = vld [vmem:[%s885_s24 + $0x80] sm:$0xff]  ;;  %v282_v31 = vadd.f32 1.0, %v154_v26  ;;  %v157_v32 = vld [vmem:[%s885_s24 + $0x88] sm:$0xff]  ;;  %v283_v33 = vadd.f32 1.0, %v155_v28 }
  0x30   : > { %400 = vst [vmem:[%s898_s17 + $0x20] sm:$0xff] %v272_v11  ;;  %v158_v34 = vld [vmem:[%s885_s24 + $0x90] sm:$0xff]  ;;  %v284_v35 = vadd.f32 1.0, %v156_v30  ;;  %v159_v36 = vld [vmem:[%s885_s24 + $0x98] sm:$0xff]  ;;  %v285_v37 = vadd.f32 1.0, %v157_v32  ;;  %v160_v38 = vld [vmem:[%s885_s24 + $0xa0] sm:$0xff] }
  0x31   : > { %401 = vst [vmem:[%s898_s17 + $0x28] sm:$0xff] %v273_v13  ;;  %v286_v39 = vadd.f32 1.0, %v158_v34  ;;  %v161_v40 = vld [vmem:[%s885_s24 + $0xa8] sm:$0xff]  ;;  %v287_v41 = vadd.f32 1.0, %v159_v36  ;;  %v162_v42 = vld [vmem:[%s885_s24 + $0xb0] sm:$0xff]  ;;  %v288_v43 = vadd.f32 1.0, %v160_v38 }
  0x32   : > { %402 = vst [vmem:[%s898_s17 + $0x30] sm:$0xff] %v274_v15  ;;  %v163_v44 = vld [vmem:[%s885_s24 + $0xb8] sm:$0xff]  ;;  %v289_v45 = vadd.f32 1.0, %v161_v40  ;;  %v164_v46 = vld [vmem:[%s885_s24 + $0xc0] sm:$0xff]  ;;  %v290_v47 = vadd.f32 1.0, %v162_v42  ;;  %v165_v48 = vld [vmem:[%s885_s24 + $0xc8] sm:$0xff] }
  0x33   : > { %403 = vst [vmem:[%s898_s17 + $0x38] sm:$0xff] %v275_v17  ;;  %v291_v49 = vadd.f32 1.0, %v163_v44  ;;  %v166_v50 = vld [vmem:[%s885_s24 + $0xd0] sm:$0xff]  ;;  %v292_v51 = vadd.f32 1.0, %v164_v46  ;;  %v167_v52 = vld [vmem:[%s885_s24 + $0xd8] sm:$0xff]  ;;  %v293_v53 = vadd.f32 1.0, %v165_v48 }
  0x34   : > { %404 = vst [vmem:[%s898_s17 + $0x40] sm:$0xff] %v276_v19  ;;  %v168_v54 = vld [vmem:[%s885_s24 + $0xe0] sm:$0xff]  ;;  %v294_v55 = vadd.f32 1.0, %v166_v50  ;;  %v169_v56 = vld [vmem:[%s885_s24 + $0xe8] sm:$0xff]  ;;  %v295_v57 = vadd.f32 1.0, %v167_v52  ;;  %v170_v58 = vld [vmem:[%s885_s24 + $0xf0] sm:$0xff] }
  0x35   : > { %405 = vst [vmem:[%s898_s17 + $0x48] sm:$0xff] %v277_v21  ;;  %v296_v59 = vadd.f32 1.0, %v168_v54  ;;  %v171_v60 = vld [vmem:[%s885_s24 + $0xf8] sm:$0xff]  ;;  %v297_v61 = vadd.f32 1.0, %v169_v56  ;;  %v172_v62 = vld [vmem:[%s885_s24 + $0x100] sm:$0xff]  ;;  %v298_v63 = vadd.f32 1.0, %v170_v58 }
  0x36   : > { %406 = vst [vmem:[%s898_s17 + $0x50] sm:$0xff] %v278_v23  ;;  %v173_v0 = vld [vmem:[%s885_s24 + $0x108] sm:$0xff]  ;;  %v299_v1 = vadd.f32 1.0, %v171_v60  ;;  %v174_v2 = vld [vmem:[%s885_s24 + $0x110] sm:$0xff]  ;;  %v300_v3 = vadd.f32 1.0, %v172_v62  ;;  %v175_v4 = vld [vmem:[%s885_s24 + $0x118] sm:$0xff] }
  0x37   : > { %407 = vst [vmem:[%s898_s17 + $0x58] sm:$0xff] %v279_v25  ;;  %v301_v5 = vadd.f32 1.0, %v173_v0  ;;  %v176_v6 = vld [vmem:[%s885_s24 + $0x120] sm:$0xff]  ;;  %v302_v7 = vadd.f32 1.0, %v174_v2  ;;  %v177_v8 = vld [vmem:[%s885_s24 + $0x128] sm:$0xff]  ;;  %v303_v9 = vadd.f32 1.0, %v175_v4 }
  0x38   : > { %408 = vst [vmem:[%s898_s17 + $0x60] sm:$0xff] %v280_v27  ;;  %v178_v10 = vld [vmem:[%s885_s24 + $0x130] sm:$0xff]  ;;  %v304_v11 = vadd.f32 1.0, %v176_v6  ;;  %v179_v12 = vld [vmem:[%s885_s24 + $0x138] sm:$0xff]  ;;  %v305_v13 = vadd.f32 1.0, %v177_v8  ;;  %v180_v14 = vld [vmem:[%s885_s24 + $0x140] sm:$0xff] }
  0x39   : > { %409 = vst [vmem:[%s898_s17 + $0x68] sm:$0xff] %v281_v29  ;;  %v306_v15 = vadd.f32 1.0, %v178_v10  ;;  %v181_v16 = vld [vmem:[%s885_s24 + $0x148] sm:$0xff]  ;;  %v307_v17 = vadd.f32 1.0, %v179_v12  ;;  %v182_v18 = vld [vmem:[%s885_s24 + $0x150] sm:$0xff]  ;;  %v308_v19 = vadd.f32 1.0, %v180_v14 }
  0x3a   : > { %410 = vst [vmem:[%s898_s17 + $0x70] sm:$0xff] %v282_v31  ;;  %v183_v20 = vld [vmem:[%s885_s24 + $0x158] sm:$0xff]  ;;  %v309_v21 = vadd.f32 1.0, %v181_v16  ;;  %v184_v22 = vld [vmem:[%s885_s24 + $0x160] sm:$0xff]  ;;  %v310_v23 = vadd.f32 1.0, %v182_v18  ;;  %v185_v24 = vld [vmem:[%s885_s24 + $0x168] sm:$0xff] }
  0x3b   : > { %411 = vst [vmem:[%s898_s17 + $0x78] sm:$0xff] %v283_v33  ;;  %v311_v25 = vadd.f32 1.0, %v183_v20  ;;  %v186_v26 = vld [vmem:[%s885_s24 + $0x170] sm:$0xff]  ;;  %v312_v27 = vadd.f32 1.0, %v184_v22  ;;  %v187_v28 = vld [vmem:[%s885_s24 + $0x178] sm:$0xff]  ;;  %v313_v29 = vadd.f32 1.0, %v185_v24 }
  0x3c   : > { %412 = vst [vmem:[%s898_s17 + $0x80] sm:$0xff] %v284_v35  ;;  %v188_v30 = vld [vmem:[%s885_s24 + $0x180] sm:$0xff]  ;;  %v314_v31 = vadd.f32 1.0, %v186_v26  ;;  %v189_v32 = vld [vmem:[%s885_s24 + $0x188] sm:$0xff]  ;;  %v315_v33 = vadd.f32 1.0, %v187_v28  ;;  %v190_v34 = vld [vmem:[%s885_s24 + $0x190] sm:$0xff] }
  0x3d   : > { %413 = vst [vmem:[%s898_s17 + $0x88] sm:$0xff] %v285_v37  ;;  %v316_v35 = vadd.f32 1.0, %v188_v30  ;;  %v191_v36 = vld [vmem:[%s885_s24 + $0x198] sm:$0xff]  ;;  %v317_v37 = vadd.f32 1.0, %v189_v32  ;;  %v192_v38 = vld [vmem:[%s885_s24 + $0x1a0] sm:$0xff]  ;;  %v193_v40 = vld [vmem:[%s885_s24 + $0x1a8] sm:$0xff] }
  0x3e   : > { %414 = vst [vmem:[%s898_s17 + $0x90] sm:$0xff] %v286_v39  ;;  %v318_v39 = vadd.f32 1.0, %v190_v34  ;;  %v194_v42 = vld [vmem:[%s885_s24 + $0x1b0] sm:$0xff]  ;;  %v195_v44 = vld [vmem:[%s885_s24 + $0x1b8] sm:$0xff]  ;;  %v196_v46 = vld [vmem:[%s885_s24 + $0x1c0] sm:$0xff]  ;;  %s540_s29 = sshll.u32 %s537_s28, 4  ;;  %s541_s29 = int_to_ptr.hbm [resolvable:$true] %s540_s29 }
  0x3f   : > { %415 = vst [vmem:[%s898_s17 + $0x98] sm:$0xff] %v287_v41  ;;  %v319_v41 = vadd.f32 1.0, %v191_v36  ;;  %v197_v48 = vld [vmem:[%s885_s24 + $0x1c8] sm:$0xff]  ;;  %v198_v50 = vld [vmem:[%s885_s24 + $0x1d0] sm:$0xff]  ;;  %v199_v52 = vld [vmem:[%s885_s24 + $0x1d8] sm:$0xff]  ;;  %s525_s30 = scalar_lea.sflag [#allocation4], %s881_s21 }
  0x40   : > { %416 = vst [vmem:[%s898_s17 + $0xa0] sm:$0xff] %v288_v43  ;;  %v320_v43 = vadd.f32 1.0, %v192_v38  ;;  %v200_v54 = vld [vmem:[%s885_s24 + $0x1e0] sm:$0xff]  ;;  %v201_v56 = vld [vmem:[%s885_s24 + $0x1e8] sm:$0xff]  ;;  %v202_v58 = vld [vmem:[%s885_s24 + $0x1f0] sm:$0xff]  ;;  %s728_s2 = sshra.s32 %s541_s29, 4  ;;  %s729_s2 = int_to_ptr.hbm [resolvable:$true] %s728_s2 }
  0x41   : > { %417 = vst [vmem:[%s898_s17 + $0xa8] sm:$0xff] %v289_v45  ;;  %v321_v45 = vadd.f32 1.0, %v193_v40  ;;  %v203_v60 = vld [vmem:[%s885_s24 + $0x1f8] sm:$0xff]  ;;  %v204_v62 = vld [vmem:[%s885_s24 + $0x200] sm:$0xff]  ;;  %v205_v0 = vld [vmem:[%s885_s24 + $0x208] sm:$0xff]  ;;  %s730_s3 = scalar_lea.hbm %s729_s2, 1024  ;;  %p735_p0 = scmp.lt.s32.totalorder %s729_s2, %s1183_s1 }
  0x42   : > { %418 = vst [vmem:[%s898_s17 + $0xb0] sm:$0xff] %v290_v47  ;;  %v322_v47 = vadd.f32 1.0, %v194_v42  ;;  %v206_v2 = vld [vmem:[%s885_s24 + $0x210] sm:$0xff]  ;;  %v207_v4 = vld [vmem:[%s885_s24 + $0x218] sm:$0xff]  ;;  %v208_v6 = vld [vmem:[%s885_s24 + $0x220] sm:$0xff]  ;;  %p731_p6 = scmp.ne.s32.totalorder %s729_s2, %s730_s3  ;;  %s734_s11 = scalar_lea.hbm %s1183_s1, 8192 }
  0x43   : > { %419 = vst [vmem:[%s898_s17 + $0xb8] sm:$0xff] %v291_v49  ;;  %v323_v49 = vadd.f32 1.0, %v195_v44  ;;  %v209_v8 = vld [vmem:[%s885_s24 + $0x228] sm:$0xff]  ;;  %v210_v10 = vld [vmem:[%s885_s24 + $0x230] sm:$0xff]  ;;  %v211_v12 = vld [vmem:[%s885_s24 + $0x238] sm:$0xff]  ;;  %p736_p2 = scmp.lt.s32.totalorder %s734_s11, %s730_s3 }
  0x44   : > { %420 = vst [vmem:[%s898_s17 + $0xc0] sm:$0xff] %v292_v51  ;;  %v324_v51 = vadd.f32 1.0, %v196_v46  ;;  %v212_v14 = vld [vmem:[%s885_s24 + $0x240] sm:$0xff]  ;;  %v213_v16 = vld [vmem:[%s885_s24 + $0x248] sm:$0xff]  ;;  %v214_v18 = vld [vmem:[%s885_s24 + $0x250] sm:$0xff]  ;;  %p732_p12 = pnand %p731_p6, %p845_p10 }
  0x45   : > { %421 = vst [vmem:[%s898_s17 + $0xc8] sm:$0xff] %v293_v53  ;;  %v325_v53 = vadd.f32 1.0, %v197_v48  ;;  %v215_v20 = vld [vmem:[%s885_s24 + $0x258] sm:$0xff]  ;;  %v216_v22 = vld [vmem:[%s885_s24 + $0x260] sm:$0xff]  ;;  %v217_v24 = vld [vmem:[%s885_s24 + $0x268] sm:$0xff]  ;;  %p737_p3 = por %p736_p2, %p735_p0 }
  0x46   : > { %422 = vst [vmem:[%s898_s17 + $0xd0] sm:$0xff] %v294_v55  ;;  %v326_v55 = vadd.f32 1.0, %v198_v50  ;;  %v218_v26 = vld [vmem:[%s885_s24 + $0x270] sm:$0xff]  ;;  %v219_v28 = vld [vmem:[%s885_s24 + $0x278] sm:$0xff]  ;;  %v220_v30 = vld [vmem:[%s885_s24 + $0x280] sm:$0xff]  ;;  %p733_p13 = pneg %p732_p12 }
  0x47   : > { %423 = vst [vmem:[%s898_s17 + $0xd8] sm:$0xff] %v295_v57  ;;  %v327_v57 = vadd.f32 1.0, %v199_v52  ;;  %v221_v32 = vld [vmem:[%s885_s24 + $0x288] sm:$0xff]  ;;  %v222_v34 = vld [vmem:[%s885_s24 + $0x290] sm:$0xff]  ;;  %v223_v36 = vld [vmem:[%s885_s24 + $0x298] sm:$0xff] }
  0x48   : > { %424 = vst [vmem:[%s898_s17 + $0xe0] sm:$0xff] %v296_v59  ;;  %v328_v59 = vadd.f32 1.0, %v200_v54  ;;  %v224_v38 = vld [vmem:[%s885_s24 + $0x2a0] sm:$0xff]  ;;  %v225_v40 = vld [vmem:[%s885_s24 + $0x2a8] sm:$0xff]  ;;  %v226_v42 = vld [vmem:[%s885_s24 + $0x2b0] sm:$0xff]  ;;  %p738_p4 = pnand %p737_p3, %p733_p13 }
  0x49   : > { %425 = vst [vmem:[%s898_s17 + $0xe8] sm:$0xff] %v297_v61  ;;  %v329_v61 = vadd.f32 1.0, %v201_v56  ;;  %v227_v44 = vld [vmem:[%s885_s24 + $0x2b8] sm:$0xff]  ;;  %v228_v46 = vld [vmem:[%s885_s24 + $0x2c0] sm:$0xff]  ;;  %v229_v48 = vld [vmem:[%s885_s24 + $0x2c8] sm:$0xff] }
  0x4a   : > { %426 = vst [vmem:[%s898_s17 + $0xf0] sm:$0xff] %v298_v63  ;;  %v330_v63 = vadd.f32 1.0, %v202_v58  ;;  %v230_v50 = vld [vmem:[%s885_s24 + $0x2d0] sm:$0xff]  ;;  %v231_v52 = vld [vmem:[%s885_s24 + $0x2d8] sm:$0xff]  ;;  %v232_v54 = vld [vmem:[%s885_s24 + $0x2e0] sm:$0xff] }
  0x4b   : > { %427 = vst [vmem:[%s898_s17 + $0xf8] sm:$0xff] %v299_v1  ;;  %v331_v1 = vadd.f32 1.0, %v203_v60  ;;  %v233_v56 = vld [vmem:[%s885_s24 + $0x2e8] sm:$0xff]  ;;  %v234_v58 = vld [vmem:[%s885_s24 + $0x2f0] sm:$0xff]  ;;  %v235_v60 = vld [vmem:[%s885_s24 + $0x2f8] sm:$0xff] }
  0x4c   : > { %428 = vst [vmem:[%s898_s17 + $0x100] sm:$0xff] %v300_v3  ;;  %v332_v3 = vadd.f32 1.0, %v204_v62  ;;  %v236_v62 = vld [vmem:[%s885_s24 + $0x300] sm:$0xff] }
  0x4d   : > { %429 = vst [vmem:[%s898_s17 + $0x108] sm:$0xff] %v301_v5  ;;  %v333_v5 = vadd.f32 1.0, %v205_v0  ;;  %v237_v0 = vld [vmem:[%s885_s24 + $0x308] sm:$0xff] }
  0x4e   : > { %430 = vst [vmem:[%s898_s17 + $0x110] sm:$0xff] %v302_v7  ;;  %v334_v7 = vadd.f32 1.0, %v206_v2  ;;  %v238_v2 = vld [vmem:[%s885_s24 + $0x310] sm:$0xff] }
  0x4f   : > { %431 = vst [vmem:[%s898_s17 + $0x118] sm:$0xff] %v303_v9  ;;  %v335_v9 = vadd.f32 1.0, %v207_v4  ;;  %v239_v4 = vld [vmem:[%s885_s24 + $0x318] sm:$0xff] }
  0x50   : > { %432 = vst [vmem:[%s898_s17 + $0x120] sm:$0xff] %v304_v11  ;;  %v336_v11 = vadd.f32 1.0, %v208_v6  ;;  %v240_v6 = vld [vmem:[%s885_s24 + $0x320] sm:$0xff] }
  0x51   : > { %433 = vst [vmem:[%s898_s17 + $0x128] sm:$0xff] %v305_v13  ;;  %v337_v13 = vadd.f32 1.0, %v209_v8  ;;  %v241_v8 = vld [vmem:[%s885_s24 + $0x328] sm:$0xff] }
  0x52   : > { %434 = vst [vmem:[%s898_s17 + $0x130] sm:$0xff] %v306_v15  ;;  %v338_v15 = vadd.f32 1.0, %v210_v10  ;;  %v242_v10 = vld [vmem:[%s885_s24 + $0x330] sm:$0xff] }
  0x53   : > { %435 = vst [vmem:[%s898_s17 + $0x138] sm:$0xff] %v307_v17  ;;  %v339_v17 = vadd.f32 1.0, %v211_v12  ;;  %v243_v12 = vld [vmem:[%s885_s24 + $0x338] sm:$0xff] }
  0x54   : > { %436 = vst [vmem:[%s898_s17 + $0x140] sm:$0xff] %v308_v19  ;;  %v340_v19 = vadd.f32 1.0, %v212_v14  ;;  %v244_v14 = vld [vmem:[%s885_s24 + $0x340] sm:$0xff] }
  0x55   : > { %437 = vst [vmem:[%s898_s17 + $0x148] sm:$0xff] %v309_v21  ;;  %v341_v21 = vadd.f32 1.0, %v213_v16  ;;  %v245_v16 = vld [vmem:[%s885_s24 + $0x348] sm:$0xff] }
  0x56   : > { %438 = vst [vmem:[%s898_s17 + $0x150] sm:$0xff] %v310_v23  ;;  %v342_v23 = vadd.f32 1.0, %v214_v18  ;;  %v246_v18 = vld [vmem:[%s885_s24 + $0x350] sm:$0xff] }
  0x57   : > { %439 = vst [vmem:[%s898_s17 + $0x158] sm:$0xff] %v311_v25  ;;  %v343_v25 = vadd.f32 1.0, %v215_v20  ;;  %v247_v20 = vld [vmem:[%s885_s24 + $0x358] sm:$0xff] }
  0x58   : > { %440 = vst [vmem:[%s898_s17 + $0x160] sm:$0xff] %v312_v27  ;;  %v344_v27 = vadd.f32 1.0, %v216_v22  ;;  %v248_v22 = vld [vmem:[%s885_s24 + $0x360] sm:$0xff] }
  0x59   : > { %441 = vst [vmem:[%s898_s17 + $0x168] sm:$0xff] %v313_v29  ;;  %v345_v29 = vadd.f32 1.0, %v217_v24  ;;  %v249_v24 = vld [vmem:[%s885_s24 + $0x368] sm:$0xff] }
  0x5a   : > { %442 = vst [vmem:[%s898_s17 + $0x170] sm:$0xff] %v314_v31  ;;  %v346_v31 = vadd.f32 1.0, %v218_v26  ;;  %v250_v26 = vld [vmem:[%s885_s24 + $0x370] sm:$0xff] }
  0x5b   : > { %443 = vst [vmem:[%s898_s17 + $0x178] sm:$0xff] %v315_v33  ;;  %v347_v33 = vadd.f32 1.0, %v219_v28  ;;  %v251_v28 = vld [vmem:[%s885_s24 + $0x378] sm:$0xff] }
  0x5c   : > { %444 = vst [vmem:[%s898_s17 + $0x180] sm:$0xff] %v316_v35  ;;  %v348_v35 = vadd.f32 1.0, %v220_v30  ;;  %v252_v30 = vld [vmem:[%s885_s24 + $0x380] sm:$0xff] }
  0x5d   : > { %445 = vst [vmem:[%s898_s17 + $0x188] sm:$0xff] %v317_v37  ;;  %v349_v37 = vadd.f32 1.0, %v221_v32  ;;  %v253_v32 = vld [vmem:[%s885_s24 + $0x388] sm:$0xff] }
  0x5e   : > { %446 = vst [vmem:[%s898_s17 + $0x190] sm:$0xff] %v318_v39  ;;  %v350_v39 = vadd.f32 1.0, %v222_v34  ;;  %v254_v34 = vld [vmem:[%s885_s24 + $0x390] sm:$0xff] }
  0x5f   : > { %447 = vst [vmem:[%s898_s17 + $0x198] sm:$0xff] %v319_v41  ;;  %v351_v41 = vadd.f32 1.0, %v223_v36  ;;  %v255_v36 = vld [vmem:[%s885_s24 + $0x398] sm:$0xff] }
  0x60   : > { %448 = vst [vmem:[%s898_s17 + $0x1a0] sm:$0xff] %v320_v43  ;;  %v352_v43 = vadd.f32 1.0, %v224_v38  ;;  %v256_v38 = vld [vmem:[%s885_s24 + $0x3a0] sm:$0xff] }
  0x61   : > { %449 = vst [vmem:[%s898_s17 + $0x1a8] sm:$0xff] %v321_v45  ;;  %v353_v45 = vadd.f32 1.0, %v225_v40  ;;  %v257_v40 = vld [vmem:[%s885_s24 + $0x3a8] sm:$0xff] }
  0x62   : > { %450 = vst [vmem:[%s898_s17 + $0x1b0] sm:$0xff] %v322_v47  ;;  %v354_v47 = vadd.f32 1.0, %v226_v42  ;;  %v258_v42 = vld [vmem:[%s885_s24 + $0x3b0] sm:$0xff] }
  0x63   : > { %451 = vst [vmem:[%s898_s17 + $0x1b8] sm:$0xff] %v323_v49  ;;  %v355_v49 = vadd.f32 1.0, %v227_v44  ;;  %v259_v44 = vld [vmem:[%s885_s24 + $0x3b8] sm:$0xff] }
  0x64   : > { %452 = vst [vmem:[%s898_s17 + $0x1c0] sm:$0xff] %v324_v51  ;;  %v356_v51 = vadd.f32 1.0, %v228_v46  ;;  %v260_v46 = vld [vmem:[%s885_s24 + $0x3c0] sm:$0xff] }
  0x65   : > { %453 = vst [vmem:[%s898_s17 + $0x1c8] sm:$0xff] %v325_v53  ;;  %v357_v53 = vadd.f32 1.0, %v229_v48  ;;  %v261_v48 = vld [vmem:[%s885_s24 + $0x3c8] sm:$0xff] }
  0x66   : > { %454 = vst [vmem:[%s898_s17 + $0x1d0] sm:$0xff] %v326_v55  ;;  %v358_v55 = vadd.f32 1.0, %v230_v50  ;;  %v262_v50 = vld [vmem:[%s885_s24 + $0x3d0] sm:$0xff] }
  0x67   : > { %455 = vst [vmem:[%s898_s17 + $0x1d8] sm:$0xff] %v327_v57  ;;  %v359_v57 = vadd.f32 1.0, %v231_v52  ;;  %v263_v52 = vld [vmem:[%s885_s24 + $0x3d8] sm:$0xff] }
  0x68   : > { %456 = vst [vmem:[%s898_s17 + $0x1e0] sm:$0xff] %v328_v59  ;;  %v360_v59 = vadd.f32 1.0, %v232_v54  ;;  %v264_v54 = vld [vmem:[%s885_s24 + $0x3e0] sm:$0xff] }
  0x69   : > { %457 = vst [vmem:[%s898_s17 + $0x1e8] sm:$0xff] %v329_v61  ;;  %v361_v61 = vadd.f32 1.0, %v233_v56  ;;  %v265_v56 = vld [vmem:[%s885_s24 + $0x3e8] sm:$0xff] }
  0x6a   : > { %458 = vst [vmem:[%s898_s17 + $0x1f0] sm:$0xff] %v330_v63  ;;  %v362_v63 = vadd.f32 1.0, %v234_v58  ;;  %v266_v58 = vld [vmem:[%s885_s24 + $0x3f0] sm:$0xff] }
  0x6b   : > { %459 = vst [vmem:[%s898_s17 + $0x1f8] sm:$0xff] %v331_v1  ;;  %v363_v1 = vadd.f32 1.0, %v235_v60  ;;  %v267_v60 = vld [vmem:[%s885_s24 + $0x3f8] sm:$0xff] }
  0x6c   : > { %460 = vst [vmem:[%s898_s17 + $0x200] sm:$0xff] %v332_v3  ;;  %v364_v3 = vadd.f32 1.0, %v236_v62  ;;  %v394_v62 = vadd.f32 1.0, %v266_v58 }
  0x6d   : > { %461 = vst [vmem:[%s898_s17 + $0x208] sm:$0xff] %v333_v5  ;;  %v365_v5 = vadd.f32 1.0, %v237_v0 }
  0x6e   : > { %462 = vst [vmem:[%s898_s17 + $0x210] sm:$0xff] %v334_v7  ;;  %v366_v7 = vadd.f32 1.0, %v238_v2 }
  0x6f   : > { %463 = vst [vmem:[%s898_s17 + $0x218] sm:$0xff] %v335_v9  ;;  %v367_v9 = vadd.f32 1.0, %v239_v4 }
  0x70   : > { %464 = vst [vmem:[%s898_s17 + $0x220] sm:$0xff] %v336_v11  ;;  %v368_v11 = vadd.f32 1.0, %v240_v6 }
  0x71   : > { %465 = vst [vmem:[%s898_s17 + $0x228] sm:$0xff] %v337_v13  ;;  %v369_v13 = vadd.f32 1.0, %v241_v8 }
  0x72   : > { %466 = vst [vmem:[%s898_s17 + $0x230] sm:$0xff] %v338_v15  ;;  %v370_v15 = vadd.f32 1.0, %v242_v10 }
  0x73   : > { %467 = vst [vmem:[%s898_s17 + $0x238] sm:$0xff] %v339_v17  ;;  %v371_v17 = vadd.f32 1.0, %v243_v12 }
  0x74   : > { %468 = vst [vmem:[%s898_s17 + $0x240] sm:$0xff] %v340_v19  ;;  %v372_v19 = vadd.f32 1.0, %v244_v14 }
  0x75   : > { %469 = vst [vmem:[%s898_s17 + $0x248] sm:$0xff] %v341_v21  ;;  %v373_v21 = vadd.f32 1.0, %v245_v16 }
  0x76   : > { %470 = vst [vmem:[%s898_s17 + $0x250] sm:$0xff] %v342_v23  ;;  %v374_v23 = vadd.f32 1.0, %v246_v18 }
  0x77   : > { %471 = vst [vmem:[%s898_s17 + $0x258] sm:$0xff] %v343_v25  ;;  %v375_v25 = vadd.f32 1.0, %v247_v20 }
  0x78   : > { %472 = vst [vmem:[%s898_s17 + $0x260] sm:$0xff] %v344_v27  ;;  %v376_v27 = vadd.f32 1.0, %v248_v22 }
  0x79   : > { %473 = vst [vmem:[%s898_s17 + $0x268] sm:$0xff] %v345_v29  ;;  %v377_v29 = vadd.f32 1.0, %v249_v24 }
  0x7a   : > { %474 = vst [vmem:[%s898_s17 + $0x270] sm:$0xff] %v346_v31  ;;  %v378_v31 = vadd.f32 1.0, %v250_v26 }
  0x7b   : > { %475 = vst [vmem:[%s898_s17 + $0x278] sm:$0xff] %v347_v33  ;;  %v379_v33 = vadd.f32 1.0, %v251_v28 }
  0x7c   : > { %476 = vst [vmem:[%s898_s17 + $0x280] sm:$0xff] %v348_v35  ;;  %v380_v35 = vadd.f32 1.0, %v252_v30 }
  0x7d   : > { %477 = vst [vmem:[%s898_s17 + $0x288] sm:$0xff] %v349_v37  ;;  %v381_v37 = vadd.f32 1.0, %v253_v32 }
  0x7e   : > { %478 = vst [vmem:[%s898_s17 + $0x290] sm:$0xff] %v350_v39  ;;  %v382_v39 = vadd.f32 1.0, %v254_v34 }
  0x7f   : > { %479 = vst [vmem:[%s898_s17 + $0x298] sm:$0xff] %v351_v41  ;;  %v383_v41 = vadd.f32 1.0, %v255_v36 }
  0x80   : > { %480 = vst [vmem:[%s898_s17 + $0x2a0] sm:$0xff] %v352_v43  ;;  %v384_v43 = vadd.f32 1.0, %v256_v38 }
  0x81   : > { %481 = vst [vmem:[%s898_s17 + $0x2a8] sm:$0xff] %v353_v45  ;;  %v385_v45 = vadd.f32 1.0, %v257_v40 }
  0x82   : > { %482 = vst [vmem:[%s898_s17 + $0x2b0] sm:$0xff] %v354_v47  ;;  %v386_v47 = vadd.f32 1.0, %v258_v42 }
  0x83   : > { %483 = vst [vmem:[%s898_s17 + $0x2b8] sm:$0xff] %v355_v49  ;;  %v387_v49 = vadd.f32 1.0, %v259_v44 }
  0x84   : > { %484 = vst [vmem:[%s898_s17 + $0x2c0] sm:$0xff] %v356_v51  ;;  %v388_v51 = vadd.f32 1.0, %v260_v46 }
  0x85   : > { %485 = vst [vmem:[%s898_s17 + $0x2c8] sm:$0xff] %v357_v53  ;;  %v389_v53 = vadd.f32 1.0, %v261_v48 }
  0x86   : > { %486 = vst [vmem:[%s898_s17 + $0x2d0] sm:$0xff] %v358_v55  ;;  %v390_v55 = vadd.f32 1.0, %v262_v50 }
  0x87   : > { %487 = vst [vmem:[%s898_s17 + $0x2d8] sm:$0xff] %v359_v57  ;;  %v391_v57 = vadd.f32 1.0, %v263_v52 }
  0x88   : > { %488 = vst [vmem:[%s898_s17 + $0x2e0] sm:$0xff] %v360_v59  ;;  %v392_v59 = vadd.f32 1.0, %v264_v54 }
  0x89   : > { %489 = vst [vmem:[%s898_s17 + $0x2e8] sm:$0xff] %v361_v61  ;;  %v393_v61 = vadd.f32 1.0, %v265_v56 }
  0x8a   : > { %490 = vst [vmem:[%s898_s17 + $0x2f0] sm:$0xff] %v362_v63  ;;  %v395_v63 = vadd.f32 1.0, %v267_v60 }
  0x8b   : > { %491 = vst [vmem:[%s898_s17 + $0x2f8] sm:$0xff] %v363_v1 }
  0x8c   : > { %492 = vst [vmem:[%s898_s17 + $0x300] sm:$0xff] %v364_v3 }
  0x8d   : > { %493 = vst [vmem:[%s898_s17 + $0x308] sm:$0xff] %v365_v5 }
  0x8e   : > { %494 = vst [vmem:[%s898_s17 + $0x310] sm:$0xff] %v366_v7 }
  0x8f   : > { %495 = vst [vmem:[%s898_s17 + $0x318] sm:$0xff] %v367_v9 }
  0x90   : > { %496 = vst [vmem:[%s898_s17 + $0x320] sm:$0xff] %v368_v11 }
  0x91   : > { %497 = vst [vmem:[%s898_s17 + $0x328] sm:$0xff] %v369_v13 }
  0x92   : > { %498 = vst [vmem:[%s898_s17 + $0x330] sm:$0xff] %v370_v15 }
  0x93   : > { %499 = vst [vmem:[%s898_s17 + $0x338] sm:$0xff] %v371_v17 }
  0x94   : > { %500 = vst [vmem:[%s898_s17 + $0x340] sm:$0xff] %v372_v19 }
  0x95   : > { %501 = vst [vmem:[%s898_s17 + $0x348] sm:$0xff] %v373_v21 }
  0x96   : > { %502 = vst [vmem:[%s898_s17 + $0x350] sm:$0xff] %v374_v23 }
  0x97   : > { %503 = vst [vmem:[%s898_s17 + $0x358] sm:$0xff] %v375_v25 }
  0x98   : > { %504 = vst [vmem:[%s898_s17 + $0x360] sm:$0xff] %v376_v27 }
  0x99   : > { %505 = vst [vmem:[%s898_s17 + $0x368] sm:$0xff] %v377_v29 }
  0x9a   : > { %506 = vst [vmem:[%s898_s17 + $0x370] sm:$0xff] %v378_v31 }
  0x9b   : > { %507 = vst [vmem:[%s898_s17 + $0x378] sm:$0xff] %v379_v33 }
  0x9c   : > { %508 = vst [vmem:[%s898_s17 + $0x380] sm:$0xff] %v380_v35 }
  0x9d   : > { %509 = vst [vmem:[%s898_s17 + $0x388] sm:$0xff] %v381_v37 }
  0x9e   : > { %510 = vst [vmem:[%s898_s17 + $0x390] sm:$0xff] %v382_v39 }
  0x9f   : > { %511 = vst [vmem:[%s898_s17 + $0x398] sm:$0xff] %v383_v41 }
  0xa0   : > { %512 = vst [vmem:[%s898_s17 + $0x3a0] sm:$0xff] %v384_v43 }
  0xa1   : > { %513 = vst [vmem:[%s898_s17 + $0x3a8] sm:$0xff] %v385_v45 }
  0xa2   : > { %514 = vst [vmem:[%s898_s17 + $0x3b0] sm:$0xff] %v386_v47 }
  0xa3   : > { %515 = vst [vmem:[%s898_s17 + $0x3b8] sm:$0xff] %v387_v49 }
  0xa4   : > { %516 = vst [vmem:[%s898_s17 + $0x3c0] sm:$0xff] %v388_v51 }
  0xa5   : > { %517 = vst [vmem:[%s898_s17 + $0x3c8] sm:$0xff] %v389_v53 }
  0xa6   : > { %518 = vst [vmem:[%s898_s17 + $0x3d0] sm:$0xff] %v390_v55 }
  0xa7   : > { %519 = vst [vmem:[%s898_s17 + $0x3d8] sm:$0xff] %v391_v57 }
  0xa8   : > { %520 = vst [vmem:[%s898_s17 + $0x3e0] sm:$0xff] %v392_v59 }
  0xa9   : > { %521 = vst [vmem:[%s898_s17 + $0x3e8] sm:$0xff] %v393_v61 }
  0xaa   : > { %522 = vst [vmem:[%s898_s17 + $0x3f0] sm:$0xff] %v394_v62 }
  0xab   : > { %523 = vst [vmem:[%s898_s17 + $0x3f8] sm:$0xff] %v395_v63 }
  0xac   : > { %741 = shalt.err (!%p738_p4)
}
  0xad   : > { %s784_s16 = smov 8192   ;;  %s785_s20 = smov 512  }
  0xae   : > { %636 = dma.vmem_to_hbm [thread:$0]  (%p845_p10), %s539_s10, 16384, %s541_s29, %s525_s30, %s784_s16, %s784_s16, %s785_s20  }
  0xaf PF: > { %p647_p5 = scmp.ge.s32.totalorder %s780_s9, 2  ;;  %s555_s21 = sand.u32 1, %s768_s6  }
  0xb0   : > { %s556_s22 = scalar_lea.sflag [#allocation4], %s555_s21 }
  0xb1   : > { %p643_p7 = pnand %p647_p5, %p849_p11 }
  0xb3   : > { %p644_p8 = pneg %p643_p7 }
  0xb5   : > { %763 = dma.done.wait (%p644_p8), %s556_s22, 16384  }
  0xb6   : > { %765 = vsyncadd (%p644_p8), %s556_s22, 4294950912  ;;  %p14_p9 = scmp.ge.s32.totalorder %s821_s12, 10   ;;  %s1189_s6 = smov %s772_s7 }
  0xb7   : > { %s1190_s7 = smov %s776_s8  ;;  %s1191_s8 = smov %s833_s15 }
  0xb8   : > { %s1192_s9 = smov %s821_s12  ;;  %16 = sbr.rel (!%p14_p9) target bundleno = 5 (0x5), region = 69 }
  0xbd   :  { %562 = vsyncpa [#allocation3], 1 }
  0xbe   :  { %564 = vsyncpa [#allocation3 + $0x1], 1 }
  0xbf   :  { %565 = vsyncpa [#allocation4], 1 }
  0xc0   :  { %567 = vsyncpa [#allocation4 + $0x1], 1 }

</bundles_post_ra>
